<compile_context>
chip_gen: v5e
topology: v5e:2x2
jax: 0.10.0
libtpu: 0.0.40
codegen_flags: <defaults>
</compile_context>

<pallas_src>
import jax
import jax.numpy as jnp
from jax.experimental import pallas as pl
from jax.experimental.pallas import tpu as pltpu


def _conv1x1_kernel(w_ref, x_ref, o_ref):
    # w_ref: (C_out, C_in)   tiny weight, resident across the whole grid
    # x_ref: (nb, C_in, ts)  activation block: channels on sublanes, pixels on lanes
    # o_ref: (nb, C_out, ts) lane-dense output block
    nb = x_ref.shape[0]
    for b in range(nb):  # nb is a small compile-time constant (<= 8): unrolled
        y = jnp.dot(w_ref[...], x_ref[b], preferred_element_type=jnp.float32)
        o_ref[b] = y.astype(o_ref.dtype)


def _vmem_limit_bytes():
    """Per-generation scoped-VMEM limit: leave headroom below physical capacity."""
    phys = 64 * 1024 * 1024  # conservative default (v7x per-TC VMEM)
    try:
        info = pltpu.get_tpu_info()
        phys = int(getattr(info, "vmem_capacity_bytes", phys))
    except Exception:
        pass
    # <= ~48 MiB on 64 MiB parts (v7x), <= 96 MiB on 128 MiB parts (v5e/v6e).
    return max(16 * 1024 * 1024, min(phys - 16 * 1024 * 1024, 96 * 1024 * 1024))


def _choose_tiles(N, C_in, C_out, HW, dtype_bytes, tile_budget_bytes):
    """Pick (batch block nb, spatial tile ts) from a double-buffered VMEM budget."""
    # Bytes per spatial column across double-buffered input + output blocks.
    per_col = 2 * (C_in + C_out) * dtype_bytes
    budget_cols = max(128, tile_budget_bytes // per_col)
    if HW > budget_cols:
        # Spatial tiling, one batch item per step; lane tile must be a multiple of 128.
        ts = max(128, min((budget_cols // 128) * 128, 65536))
        nb = 1
    else:
        # Whole feature map fits in one block: use the full spatial extent and fold
        # batch items into the block to amortize the ~600-cycle per-step overhead.
        ts = HW
        nb = max(1, min(budget_cols // HW, N, 8))
        if N >= 2:
            nb = min(nb, max(1, N // 2))  # keep >= 2 grid points for v7x megacore
    return nb, ts


def conv1x1_pallas(x_nchw, weight_oi, *, compute_dtype=None):
    """1x1 conv, no bias, NCHW-native.

    x_nchw:        (N, C_in, H, W)
    weight_oi:     (C_out, C_in)   (PyTorch conv weight squeezed over the 1x1 dims)
    compute_dtype: optional (e.g. jnp.bfloat16) to halve HBM traffic; f32 accumulate,
                   result cast back to x_nchw.dtype.
    returns        (N, C_out, H, W)
    """
    N, C_in, H, W = x_nchw.shape
    C_out, wc_in = weight_oi.shape
    assert wc_in == C_in
    HW = H * W

    out_dtype = x_nchw.dtype
    if compute_dtype is not None:
        x_nchw = x_nchw.astype(compute_dtype)
        weight_oi = weight_oi.astype(compute_dtype)

    # Free view: NCHW -> (N, C_in, H*W). No transpose, no extra HBM pass.
    x = x_nchw.reshape(N, C_in, HW)
    dtype_bytes = jnp.dtype(x.dtype).itemsize

    vmem_limit = _vmem_limit_bytes()
    nb, ts = _choose_tiles(N, C_in, C_out, HW, dtype_bytes, vmem_limit // 2)

    n_blocks = -(-N // nb)
    s_blocks = -(-HW // ts)
    # Degenerate (1,1) grid leaves one v7x TensorCore idle: split spatially if possible.
    if n_blocks * s_blocks < 2 and HW >= 256:
        ts = (((HW + 1) // 2) + 127) // 128 * 128
        s_blocks = -(-HW // ts)
    grid = (n_blocks, s_blocks)

    cost = pl.CostEstimate(
        flops=2 * N * HW * C_in * C_out,
        transcendentals=0,
        bytes_accessed=(N * HW * (C_in + C_out) + C_in * C_out) * dtype_bytes,
    )

    out = pl.pallas_call(
        _conv1x1_kernel,
        out_shape=jax.ShapeDtypeStruct((N, C_out, HW), x.dtype),
        grid_spec=pltpu.PrefetchScalarGridSpec(
            num_scalar_prefetch=0,
            grid=grid,
            in_specs=[
                # Tiny weight: same block every step, stays resident in VMEM.
                pl.BlockSpec((C_out, C_in), lambda n, s: (0, 0)),
                # Activation block: (nb, C_in, ts) per (batch-block, spatial-block).
                # TODO(synk): if a v7x trace shows exposed DMA at pipeline fill, add
                # pipeline_mode=pl.Buffered(3) here (costs one extra activation block).
                pl.BlockSpec((nb, C_in, ts), lambda n, s: (n, 0, s)),
            ],
            out_specs=pl.BlockSpec((nb, C_out, ts), lambda n, s: (n, 0, s)),
        ),
        compiler_params=pltpu.CompilerParams(
            # Both axes independent -> shardable across v7x's two TensorCores.
            dimension_semantics=("parallel", "parallel"),
            vmem_limit_bytes=int(vmem_limit),
        ),
        cost_estimate=cost,
    )(weight_oi, x)

    out = out.reshape(N, C_out, H, W)
    if compute_dtype is not None and out.dtype != out_dtype:
        out = out.astype(out_dtype)
    return out


class ConcatReduction:
    """JAX port of `concat_reduction`. cfg reduced to the fields the forward uses."""

    def __init__(self, out_channels_last, concat_features, concat_layers, key):
        inplanes = out_channels_last * 2
        outplanes = out_channels_last
        self.concat_features = concat_features
        self.concat_layers = concat_layers
        # nn.Conv2d(inplanes, outplanes, kernel_size=1, bias=False) weight:
        # shape (outplanes, inplanes, 1, 1) -> squeeze to (outplanes, inplanes)
        self.weight = (
            jax.random.normal(key, (outplanes, inplanes), dtype=jnp.float32) * 0.05
        )

    def __call__(self, features, compute_dtype=None):
        if self.concat_features:
            layer = self.concat_layers[0]
            out = features[layer]
            features = list(features)
            features[layer] = conv1x1_pallas(
                out, self.weight, compute_dtype=compute_dtype
            )
            return features
        return features


if __name__ == "__main__":
    key = jax.random.PRNGKey(0)
    k_w, k_x0, k_x1 = jax.random.split(key, 3)

    # Small config: OUT_CHANNELS[-1] = 4 -> conv maps 8 -> 4 channels.
    C = 4
    module = ConcatReduction(
        out_channels_last=C, concat_features=True, concat_layers=[1], key=k_w
    )

    # features: list of NCHW tensors; only features[1] (the concat layer) has 2*C channels.
    feat0 = jax.random.normal(k_x0, (2, C, 16, 16), dtype=jnp.float32)
    feat1 = jax.random.normal(k_x1, (2, 2 * C, 16, 16), dtype=jnp.float32)
    features = [feat0, feat1]

    # f32 path (exact module semantics).
    out_features = module(features)
    result = jax.block_until_ready(out_features[1])

    ref = jnp.einsum("nchw,oc->nohw", feat1, module.weight)
    assert result.shape == (2, C, 16, 16)
    assert out_features[0] is feat0  # untouched layers pass through
    assert jnp.allclose(result, ref, atol=1e-5, rtol=1e-5)

    # Optional bf16 compute path (halves HBM traffic on this memory-bound op).
    out_bf16 = module(features, compute_dtype=jnp.bfloat16)
    result_bf16 = jax.block_until_ready(out_bf16[1])
    assert result_bf16.dtype == jnp.float32
    assert jnp.allclose(result_bf16, ref, atol=5e-2, rtol=5e-2)

    print("KERNEL_OK")
</pallas_src>

<mosaic_0001>
module attributes {stable_mosaic.version = 11 : i64} {
  func.func @_conv1x1_kernel(%arg0: i32, %arg1: i32, %arg2: memref<4x8xf32, #tpu.memory_space<vmem>>, %arg3: memref<1x8x256xf32, #tpu.memory_space<vmem>>, %arg4: memref<1x4x256xf32, #tpu.memory_space<vmem>>) attributes {dimension_semantics = [#tpu.dimension_semantics<parallel>, #tpu.dimension_semantics<parallel>], iteration_bounds = array<i64: 2, 1>, scalar_prefetch = 0 : i64, scratch_operands = 0 : i64, tpu.core_type = #tpu.core_type<tc>, window_params = [{pipeline_mode = #tpu.pipeline_mode<synchronous>, transform_indices = @transform_0, window_bounds = array<i64: 4, 8>}, {transform_indices = @transform_1, window_bounds = array<i64: 1, 8, 256>}, {transform_indices = @transform_2, window_bounds = array<i64: 1, 4, 256>}]} {
    %c0 = arith.constant 0 : index
    %c0_0 = arith.constant 0 : index
    %0 = vector.load %arg2[%c0, %c0_0] : memref<4x8xf32, #tpu.memory_space<vmem>>, vector<4x8xf32>
    %c0_1 = arith.constant 0 : index
    %c0_2 = arith.constant 0 : index
    %c0_3 = arith.constant 0 : index
    %1 = vector.load %arg3[%c0_1, %c0_2, %c0_3] : memref<1x8x256xf32, #tpu.memory_space<vmem>>, vector<1x8x256xf32>
    %2 = vector.shape_cast %1 : vector<1x8x256xf32> to vector<8x256xf32>
    %cst = arith.constant dense<0.000000e+00> : vector<4x256xf32>
    %3 = tpu.matmul %0, %2, %cst {dimension_numbers = #tpu.dot_dimension_numbers<[1], [0], [0], [1], [0, 0, 1, 1], [], []>} : vector<4x8xf32>, vector<8x256xf32>, vector<4x256xf32> -> vector<4x256xf32>
    %c0_4 = arith.constant 0 : index
    %c0_5 = arith.constant 0 : index
    %c0_6 = arith.constant 0 : index
    %4 = vector.load %arg4[%c0_4, %c0_5, %c0_6] : memref<1x4x256xf32, #tpu.memory_space<vmem>>, vector<1x4x256xf32>
    %5 = vector.shape_cast %4 : vector<1x4x256xf32> to vector<4x256xf32>
    %6 = vector.shape_cast %3 : vector<4x256xf32> to vector<1x4x256xf32>
    tpu.vector_store %arg4[%c0_4, %c0_5, %c0_6], %6 {strides = array<i32>} : memref<1x4x256xf32, #tpu.memory_space<vmem>>, vector<1x4x256xf32>,
    return
  }
  func.func @transform_0(%arg0: i32, %arg1: i32) -> (i32, i32) {
    %c0_i32 = arith.constant 0 : i32
    %c0_i32_0 = arith.constant 0 : i32
    %c0_i32_1 = arith.constant 0 : i32
    return %c0_i32, %c0_i32_0 : i32, i32
  }
  func.func @transform_1(%arg0: i32, %arg1: i32) -> (i32, i32, i32) {
    %c0_i32 = arith.constant 0 : i32
    %c0_i32_0 = arith.constant 0 : i32
    return %arg0, %c0_i32, %arg1 : i32, i32, i32
  }
  func.func @transform_2(%arg0: i32, %arg1: i32) -> (i32, i32, i32) {
    %c0_i32 = arith.constant 0 : i32
    %c0_i32_0 = arith.constant 0 : i32
    return %arg0, %c0_i32, %arg1 : i32, i32, i32
  }
}

</mosaic_0001>

<bundles_post_ra>
// kernel: tpu_custom_call.1
= control target key start
LH: loop header
LB: loop body
LE: loop exit
PB: predicated region body
PF: predicated region fallthrough
CT: control target
= control target key end

     0   :  { %7 = vsyncpa [#allocation3], 0  ;;  %s774_s0 = inlined_call_operand.hbm [shape: f32[4,8], index: 0, kind: input, shape index: {}]   ;;  %s775_s1 = inlined_call_operand.hbm [shape: f32[2,8,256], index: 1, kind: input, shape index: {}]   ;;  %s776_s2 = inlined_call_operand.hbm [shape: f32[2,4,256], index: 2, kind: output, shape index: {}]  }
   0x1   :  { %8 = vsyncpa [#allocation6], 0 }
   0x2   :  { %10 = vsyncpa [#allocation6 + $0x1], 0 }
   0x3   :  { %11 = vsyncpa [#allocation4], 0 }
   0x4   :  { %13 = vsyncpa [#allocation4 + $0x1], 0  ;;  %s624_s9 = smov 0   ;;  %s626_s10 = smov 0  }
   0x5   :  { %s628_s11 = smov 0   ;;  %s630_s12 = smov 0  }
   0x6   :  { %s632_s13 = smov 0   ;;  %s634_s14 = smov 0  }
   0x7 LB: > { %s366_s15 = sadd.s32 4294967295, %s606_s14   ;;  %s367_s16 = sadd.s32 4294967294, %s606_s14   ;;  %s606_s14 = sphi %s634_s14, %s19_s14   ;;  %s602_s13 = sphi %s632_s13, %s788_s13   ;;  %s598_s12 = sphi %s630_s12, %s787_s12   ;;  %s594_s11 = sphi %s628_s11, %s786_s11   ;;  %s590_s10 = sphi %s626_s10, %s785_s10   ;;  %s586_s9 = sphi %s624_s9, %s784_s9  }
   0x8   : > { %p74_p0 = scmp.ne.s32.totalorder %s590_s10, %s586_s9  ;;  %p658_p1 = scmp.eq.s32.totalorder %s366_s15, 0 }
   0x9   : > { %p662_p2 = scmp.eq.s32.totalorder %s366_s15, 1  ;;  %p106_p3 = scmp.eq.s32.totalorder %s367_s16, 1 }
   0xa   : > { %p668_p4 = por %p658_p1, %p74_p0  ;;  %p368_p5 = scmp.ge.s32.totalorder %s606_s14, 1 }
   0xb   : > { %p673_p6 = por %p106_p3, %p74_p0  ;;  %p113_p7 = scmp.lt.s32.totalorder %s606_s14, 3 }
   0xc   : > { %s125_s23 = sshll.u32 %s774_s0, 4  ;;  %p370_p9 = scmp.ge.s32.totalorder %s606_s14, 2  ;;  %s126_s23 = int_to_ptr.hbm [resolvable:$true] %s125_s23 }
   0xd   : > { %p681_p8 = pnand %p368_p5, %p113_p7  ;;  %s608_s25 = smov [#allocation2]  }
   0xe   : > { %s127_s26 = sshll.u32 %s608_s25, 4  ;;  %s31_s27 = sadd.s32 1, %s602_s13  ;;  %s128_s26 = int_to_ptr.vmem [resolvable:$true] %s127_s26 }
   0xf   : > { %p395_p10 = pneg %p681_p8  ;;  %p33_p12 = scmp.ge.s32.totalorder %s31_s27, 2 }
  0x10   : > { %s61_s28 = sadd.s32 1, %s594_s11  ;;  %p68_p13 = scmp.ne.s32.totalorder %s594_s11, %s590_s10 }
  0x11   : > { %p396_p11 = pnand %p395_p10, %p658_p1  ;;  %p69_p0 = scmp.eq.s32.totalorder %s606_s14, 0 }
  0x12   : > { %s790_s27 = smov (%p33_p12, %s31_s27), 0  ;;  %p703_p5 = por %p662_p2, %p68_p13 }
  0x13   : > { %398 = dma.hbm_to_vmem [thread:$0]  (!%p396_p11), %s126_s23, 64, %s128_s26, [#allocation3]  }
  0x14   : > { %p697_p3 = por %p69_p0, %p68_p13  ;;  %s56_s3 = ssub.s32 %s602_s13, %s790_s27 }
  0x15   : > { %p408_p7 = scmp.lt.s32.totalorder %s606_s14, 2  ;;  %p59_p10 = scmp.eq.s32.totalorder %s56_s3, 0 }
  0x16   : > { %s138_s4 = sand.u32 1, %s594_s11   ;;  %s385_s7 = sshll.u32 %s602_s13, 4 }
  0x17   : > { %s371_s5 = sshll.u32 %s138_s4, 4  ;;  %s149_s16 = scalar_lea.hbm %s775_s1, %s385_s7 }
  0x18   : > { %s712_s6 = scalar_select %p59_p10, %s594_s11, %s61_s28  }
  0x19   : > { %s142_s21 = scalar_lea.vmem [#allocation5], %s371_s5  ;;  %s151_s18 = sshll.u32 %s149_s16, 4  ;;  %s152_s18 = int_to_ptr.hbm [resolvable:$true] %s151_s18 }
  0x1a   : > { %s153_s22 = sshll.u32 %s142_s21, 4  ;;  %p400_p2 = pnand %p408_p7, %p697_p3  ;;  %s154_s22 = int_to_ptr.vmem [resolvable:$true] %s153_s22 }
  0x1b   : > { %s139_s23 = scalar_lea.sflag [#allocation6], %s138_s4  ;;  %162 = sbr.rel (%p681_p8) target bundleno = 171 (0xab), region = 28 }
  0x1c   : > { %402 = dma.hbm_to_vmem [thread:$0]  (!%p400_p2), %s152_s18, 256, %s154_s22, %s139_s23  }
  0x20   : > { %573 = dma.done.wait (%p658_p1), [#allocation3], 64  }
  0x21   : > { %575 = vsyncadd (%p658_p1), [#allocation3], 4294967232  ;;  %s727_s25 = sand.u32 1, %s590_s10  }
  0x22   : > { %s376_s26 = sshll.u32 %s727_s25, 4  ;;  %s170_s28 = scalar_lea.sflag [#allocation6], %s727_s25 }
  0x23   : > { %s173_s29 = scalar_lea.vmem [#allocation5], %s376_s26 }
  0x24   : > { %577 = dma.done.wait (%p668_p4), %s170_s28, 256  }
  0x25   : > { %579 = vsyncadd (%p668_p4), %s170_s28, 4294967040  ;;  %vm200_vm0 = vcmask 64512   ;;  %v199_v0 = vld [vmem:[%s173_s29 + $0x8] sm:$0xff]  ;;  %v198_v2 = vld [vmem:[%s173_s29] sm:$0xff]  ;;  %s377_s17 = sshll.u32 %s727_s25, 3  ;;  %s386_s24 = sshll.u32 %s598_s12, 3 }
  0x26   : > { %v197_v1 = vld [vmem:[#allocation2] sm:$0xf]  ;;  %239 = vmatpush.msra.mxu1 %v199_v0  ;;  %219 = vmatpush.msra.mxu0 %v198_v2  ;;  %s265_s5 = scalar_lea.hbm %s776_s2, %s386_s24  ;;  %s194_s7 = scalar_lea.vmem [#allocation7], %s377_s17  ;;  %vm247_vm1 = vcmask 1043456  }
  0x27   : > { %379 = vmatmul.msk.f32.vlgmr.msra.gmra.mxu1 %vm200_vm0, %v197_v1  ;;  %378 = vmatmul.msk.f32.vlgmr.msra.gmra.mxu0 %vm200_vm0, %v197_v1  ;;  %s267_s19 = sshll.u32 %s194_s7, 4  ;;  %s269_s8 = sshll.u32 %s265_s5, 4  ;;  %s268_s19 = int_to_ptr.vmem [resolvable:$true] %s267_s19  ;;  %s270_s8 = int_to_ptr.hbm [resolvable:$true] %s269_s8 }
  0x28   : > { %s252_s15 = scalar_lea.sflag [#allocation4], %s727_s25  ;;  %s534_s16 = sshra.s32 %s270_s8, 4  ;;  %s535_s16 = int_to_ptr.hbm [resolvable:$true] %s534_s16 }
  0x29   : > { %s536_s12 = scalar_lea.hbm %s535_s16, 8  ;;  %s540_s18 = scalar_lea.hbm %s776_s2, 16 }
  0x2a   : > { %p537_p1 = scmp.ne.s32.totalorder %s535_s16, %s536_s12  ;;  %p541_p11 = scmp.lt.s32.totalorder %s535_s16, %s776_s2 }
  0x2b   : > { %p542_p12 = scmp.lt.s32.totalorder %s540_s18, %s536_s12 }
  0x2c   : > { %p538_p4 = pnand %p537_p1, %p703_p5 }
  0x2d   : > { %p543_p13 = por %p542_p12, %p541_p11 }
  0x2e   : > { %p539_p8 = pneg %p538_p4 }
  0x30   : > { %p544_p0 = pnand %p543_p13, %p539_p8 }
  0xa4   : > { %v241_v3 = vpop.f32.mrf.mxu1  ;;  %v221_v4 = vpop.f32.mrf.mxu0 }
  0xa5   : > { %v246_v5 = vrot.slane %v241_v3, 4 }
  0xa7   : > { %v248_v6 = vsel %vm247_vm1, %v221_v4, %v246_v5 }
  0xa8   : > { %250 = vst [vmem:[%s194_s7] sm:$0xff] %v248_v6 }
  0xa9   : > { %547 = shalt.err (!%p544_p0)
}
  0xaa   : > { %393 = dma.vmem_to_hbm [thread:$0]  (%p703_p5), %s268_s19, 128, %s270_s8, %s252_s15  }
  0xab PF: > { %s281_s25 = sand.u32 1, %s586_s9   ;;  %p404_p3 = pnand %p370_p9, %p673_p6 }
  0xac   : > { %s282_s28 = scalar_lea.sflag [#allocation4], %s281_s25 }
  0xad   : > { %p405_p7 = pneg %p404_p3 }
  0xaf   : > { %581 = dma.done.wait (%p405_p7), %s282_s28, 128  }
  0xb0   : > { %583 = vsyncadd (%p405_p7), %s282_s28, 4294967168  ;;  %s19_s14 = sadd.s32 1, %s606_s14   ;;  %s784_s9 = smov %s590_s10 }
  0xb1   : > { %p16_p10 = scmp.ge.s32.totalorder %s19_s14, 4   ;;  %s785_s10 = smov %s594_s11 }
  0xb2   : > { %s786_s11 = smov %s712_s6  ;;  %s787_s12 = smov %s602_s13 }
  0xb3   : > { %s788_s13 = smov %s790_s27  ;;  %18 = sbr.rel (!%p16_p10) target bundleno = 7 (0x7), region = 78 }
  0xb8   :  { %288 = vsyncpa [#allocation3], 1 }
  0xb9   :  { %290 = vsyncpa [#allocation3 + $0x1], 1 }
  0xba   :  { %291 = vsyncpa [#allocation6], 1 }
  0xbb   :  { %293 = vsyncpa [#allocation6 + $0x1], 1 }
  0xbc   :  { %294 = vsyncpa [#allocation4], 1 }
  0xbd   :  { %296 = vsyncpa [#allocation4 + $0x1], 1 }

</bundles_post_ra>
